<compile_context>
chip_gen: v7x
topology: tpu7x:2x2x1
jax: 0.10.0
libtpu: 0.0.40
codegen_flags: <defaults>
</compile_context>

<pallas_src>
import math

import jax
import jax.numpy as jnp
import numpy as np
from jax.experimental import pallas as pl
from jax.experimental.pallas import tpu as pltpu


def _erf(x):
    # Abramowitz & Stegun 7.1.26 polynomial, |err| < 1.5e-7 (f32 precision); the exp
    # rides the EUP slot.  Matches torch's exact (erf-based) nn.GELU.
    a1, a2, a3, a4, a5 = 0.254829592, -0.284496736, 1.421413741, -1.453152027, 1.061405429
    p = 0.3275911
    ax = jnp.abs(x)
    t = 1.0 / (1.0 + p * ax)
    poly = ((((a5 * t + a4) * t + a3) * t + a2) * t + a1) * t
    y = 1.0 - poly * jnp.exp(-ax * ax)
    return jnp.where(x >= 0, y, -y)


def _layernorm(x, g, b, eps=1e-5):
    mu = jnp.mean(x, axis=-1, keepdims=True)
    var = jnp.mean((x - mu) ** 2, axis=-1, keepdims=True)   # biased var, like torch LN
    return (x - mu) / jnp.sqrt(var + eps) * g + b


PARAM_ORDER = [
    "ln1_g", "ln1_b", "w1", "b1",
    "wq", "bq", "wk", "bk", "wv", "bv", "wo", "bo",
    "ln2_g", "ln2_b", "w2", "b2",
    "ln3_g", "ln3_b", "w3", "b3",
    "ln4_g", "ln4_b", "w4", "b4",
]

_MATMUL_WEIGHTS = ("w1", "wq", "wk", "wv", "wo", "w2", "w3", "w4")


def _make_kernel(num_heads, dim):
    D = dim
    H = num_heads
    Dh = dim // num_heads
    bf16 = jnp.bfloat16
    f32 = jnp.float32

    def kernel(x_ref, cos_ref, sina_ref, sinb_ref,
               ln1g, ln1b, w1, b1,
               wq, bq, wk, bk, wv, bv, wo, bo,
               ln2g, ln2b, w2, b2,
               ln3g, ln3b, w3, b3,
               ln4g, ln4b, w4, b4,
               o_ref):
        x = x_ref[0]                                              # (N, D) f32
        N = x.shape[0]

        # Rotary tables (stored bf16 in HBM/VMEM, upcast once; the rotation math and
        # everything downstream of the bf16 matmuls stays f32 on the VPU).
        cosf = cos_ref[...].astype(f32)
        sina = sina_ref[...].astype(f32)
        sinb = sinb_ref[...].astype(f32)

        def rot(t):
            # rotate_half as two XLU lane rolls + VPU FMAs (no D x D permute matmul).
            # Correctness invariant (asserted host-side in make_rotary_tables): sina
            # is nonzero only on even lanes of each head's rotary region and sinb only
            # on odd ones, so cross-head and 127->0 circular-wrap leakage cancels.
            up = pltpu.roll(t, D - 1, 1)                          # up[:, i] = t[:, i+1]
            dn = pltpu.roll(t, 1, 1)                              # dn[:, i] = t[:, i-1]
            return t * cosf + up * sina + dn * sinb

        def mm(a, w_ref):
            # bf16 operands on the MXU, f32 accumulation.
            return jnp.dot(a.astype(bf16), w_ref[...], preferred_element_type=f32)

        # ---------------- encode: LN -> Linear -> attention -> LN -> Linear --------
        h = _layernorm(x, ln1g[...], ln1b[...])
        h = mm(h, w1) + b1[...]

        q = rot(mm(h, wq) + bq[...])      # 1/sqrt(Dh) already folded into wq/bq
        k = rot(mm(h, wk) + bk[...])
        v = mm(h, wv) + bv[...]

        # Head-batched attention: one (H, N, N) score matmul and one (H, N, Dh) PV
        # matmul (bounded live ranges, no per-head Python unrolling, no 32-lane
        # masked stores).  Softmax stays f32 with an exact divide for reference parity.
        # TODO(synk): for realistic N (>= 1024) add a query-tile grid axis with
        # flash-style online softmax so the (H, N, N) scores never materialize
        # (required to fit v7x's 64 MiB VMEM alongside resident weights).
        qh = jnp.transpose(q.astype(bf16).reshape(N, H, Dh), (1, 0, 2))
        kh = jnp.transpose(k.astype(bf16).reshape(N, H, Dh), (1, 0, 2))
        vh = jnp.transpose(v.astype(bf16).reshape(N, H, Dh), (1, 0, 2))

        s = jnp.einsum("hqd,hkd->hqk", qh, kh, preferred_element_type=f32)
        s = s - jnp.max(s, axis=-1, keepdims=True)
        e = jnp.exp(s)
        probs = e / jnp.sum(e, axis=-1, keepdims=True)
        oh = jnp.einsum("hqk,hkd->hqd", probs.astype(bf16), vh,
                        preferred_element_type=f32)               # (H, N, Dh)
        attn = jnp.transpose(oh, (1, 0, 2)).reshape(N, D)         # lane-dense (N, D)

        h = mm(attn, wo) + bo[...]
        h = _layernorm(h, ln2g[...], ln2b[...])
        h = mm(h, w2) + b2[...]
        inter = h + x                                             # first residual

        # ---------------- encode2: LN -> Linear -> GELU -> LN -> Linear ------------
        g = _layernorm(inter, ln3g[...], ln3b[...])
        g = mm(g, w3) + b3[...]
        g = 0.5 * g * (1.0 + _erf(g * 0.7071067811865476))        # exact-form GELU
        g = _layernorm(g, ln4g[...], ln4b[...])
        g = mm(g, w4) + b4[...]

        o_ref[0] = (g + inter).astype(o_ref.dtype)                # second residual

    return kernel


def make_rotary_tables(N, dim, num_heads):
    """Rotary tables for RotaryEmbedding(dim=floor(dim/num_heads/2), freqs_for='pixel',
    max_freq=10), with the rotate_half sign pre-folded into two sin tables so that

        rotated = x * cos + roll_up(x) * sin_a + roll_down(x) * sin_b

    where roll_up(x)[i] = x[i+1], roll_down(x)[i] = x[i-1] (circular).  sin_a lives on
    even lanes (-sin), sin_b on odd lanes (+sin); both are exactly zero on the
    pass-through dims, which the roll-based kernel rotary requires.  Tables are
    returned in bf16 (halves DMA/VMEM; they only ever feed bf16 matmuls)."""
    Dh = dim // num_heads
    rd = math.floor(dim / num_heads / 2)
    nf = rd // 2
    rot_dim = 2 * nf
    t = jnp.arange(N, dtype=jnp.float32)

    cos_head = jnp.ones((N, Dh), jnp.float32)
    sin_a_head = jnp.zeros((N, Dh), jnp.float32)
    sin_b_head = jnp.zeros((N, Dh), jnp.float32)
    if nf > 0:
        freqs = jnp.linspace(1.0, 10.0 / 2.0, nf) * math.pi
        ang = t[:, None] * freqs[None, :]                         # (N, nf)
        ang2 = jnp.repeat(ang, 2, axis=-1)                        # (N, rot_dim)
        cosv, sinv = jnp.cos(ang2), jnp.sin(ang2)
        even = (jnp.arange(rot_dim) % 2) == 0
        cos_head = cos_head.at[:, :rot_dim].set(cosv)
        sin_a_head = sin_a_head.at[:, :rot_dim].set(jnp.where(even, -sinv, 0.0))
        sin_b_head = sin_b_head.at[:, :rot_dim].set(jnp.where(even, 0.0, sinv))

    cos_full = jnp.tile(cos_head, (1, num_heads))                 # (N, D)
    sin_a_full = jnp.tile(sin_a_head, (1, num_heads))
    sin_b_full = jnp.tile(sin_b_head, (1, num_heads))

    # Assert the zero-lane invariant the in-kernel roll formulation depends on.
    lane = np.arange(dim) % Dh
    passthrough = lane >= rot_dim
    even_lane = (lane % 2) == 0
    sa, sb = np.asarray(sin_a_full), np.asarray(sin_b_full)
    assert np.all(sa[:, passthrough | ~even_lane] == 0.0), "sin_a leakage lanes nonzero"
    assert np.all(sb[:, passthrough | even_lane] == 0.0), "sin_b leakage lanes nonzero"

    bf16 = jnp.bfloat16
    return cos_full.astype(bf16), sin_a_full.astype(bf16), sin_b_full.astype(bf16)


def _pltpu_roll_matches_numpy():
    """Tiny one-shot probe: does pltpu.roll follow np.roll's direction convention?
    (If not, swapping the two sin tables exactly compensates.)"""
    def probe(x_ref, o_ref):
        o_ref[...] = pltpu.roll(x_ref[...], 1, 1)
    x = jnp.tile(jnp.arange(128, dtype=jnp.float32)[None, :], (8, 1))
    y = pl.pallas_call(probe, out_shape=jax.ShapeDtypeStruct((8, 128), jnp.float32))(x)
    return bool(float(y[0, 1]) == 0.0)       # np.roll: y[:, i] == x[:, i-1]


def _vmem_budget_bytes(N, D, H):
    """Single (not double-counted) VMEM estimate, clamped to device capacity minus
    compiler headroom (perf-review fix for the doubled-then-doubled 64 MiB cap)."""
    const_bytes = 8 * D * D * 2 + 16 * D * 4 + 3 * N * D * 2     # single-buffered consts
    io_bytes = 2 * (N * D * 4) * 2                               # double-buffered x / out
    live_bytes = 12 * N * D * 4 + 3 * H * N * N * 4 + 3 * N * D * 2
    needed = const_bytes + io_bytes + live_bytes + (4 << 20)
    try:
        cap = pltpu.get_tpu_info().vmem_capacity_bytes
    except Exception:                                            # interpret / query unavailable
        cap = 128 * 1024 * 1024
    headroom = 8 * 1024 * 1024                                   # v7x: 64 MiB total -> ~56 MiB
    return int(min(max(needed, 32 * 1024 * 1024), cap - headroom))


def init_params(key, dim):
    keys = iter(jax.random.split(key, 32))

    def lin():
        w = jax.random.normal(next(keys), (dim, dim), jnp.float32) / math.sqrt(dim)
        b = 0.02 * jax.random.normal(next(keys), (1, dim), jnp.float32)
        return w, b

    def ln():
        g = 1.0 + 0.05 * jax.random.normal(next(keys), (1, dim), jnp.float32)
        b = 0.05 * jax.random.normal(next(keys), (1, dim), jnp.float32)
        return g, b

    p = {}
    p["ln1_g"], p["ln1_b"] = ln()
    p["w1"], p["b1"] = lin()
    p["wq"], p["bq"] = lin()
    p["wk"], p["bk"] = lin()
    p["wv"], p["bv"] = lin()
    p["wo"], p["bo"] = lin()
    p["ln2_g"], p["ln2_b"] = ln()
    p["w2"], p["b2"] = lin()
    p["ln3_g"], p["ln3_b"] = ln()
    p["w3"], p["b3"] = lin()
    p["ln4_g"], p["ln4_b"] = ln()
    p["w4"], p["b4"] = lin()
    return p


def vision_encoder_forward(x, params, rotary, num_heads, *, roll_matches_numpy=True):
    B, N, D = x.shape
    Dh = D // num_heads
    scale = 1.0 / math.sqrt(Dh)

    cosf, sin_a, sin_b = rotary
    if not roll_matches_numpy:
        sin_a, sin_b = sin_b, sin_a           # compensates a flipped roll convention

    # Fold the attention scale into the query projection, then cast matmul weights to
    # bf16 once on the host (halves their VMEM footprint; MXU-native dtype).
    prepared = dict(params)
    prepared["wq"] = prepared["wq"] * scale
    prepared["bq"] = prepared["bq"] * scale
    for name in _MATMUL_WEIGHTS:
        prepared[name] = prepared[name].astype(jnp.bfloat16)
    param_list = [prepared[k] for k in PARAM_ORDER]

    kernel = _make_kernel(num_heads, D)

    # Constant-index inputs (weights, biases, LN params, rotary tables) are
    # single-buffered: their block index never changes across the B grid, so the
    # default double-buffering would only waste VMEM.
    def const_spec(shape):
        return pl.BlockSpec(shape, lambda b: (0,) * len(shape),
                            pipeline_mode=pl.Buffered(1))

    in_specs = [pl.BlockSpec((1, N, D), lambda b: (b, 0, 0))]
    in_specs += [const_spec(t.shape) for t in (cosf, sin_a, sin_b)]
    in_specs += [const_spec(p.shape) for p in param_list]

    return pl.pallas_call(
        kernel,
        out_shape=jax.ShapeDtypeStruct((B, N, D), x.dtype),
        grid_spec=pltpu.PrefetchScalarGridSpec(
            num_scalar_prefetch=0,
            grid=(B,),                                            # parallel -> both v7x TCs
            in_specs=in_specs,
            out_specs=pl.BlockSpec((1, N, D), lambda b: (b, 0, 0)),
        ),
        compiler_params=pltpu.CompilerParams(
            dimension_semantics=("parallel",),
            vmem_limit_bytes=_vmem_budget_bytes(N, D, num_heads),
        ),
    )(x, cosf, sin_a, sin_b, *param_list)


def reference_forward(x, params, num_heads):
    """Pure-JAX reference mirroring the kernel math (bf16 matmul operands, f32 accum,
    bf16 rotary tables, exact softmax, erf GELU) but with the textbook interleaved
    rotate_half formulation, for a mixed-precision tolerance check."""
    B, N, D = x.shape
    Dh = D // num_heads
    scale = 1.0 / math.sqrt(Dh)
    bf16 = jnp.bfloat16
    f32 = jnp.float32
    p = params

    def mm(a, w):
        return jnp.dot(a.astype(bf16), w.astype(bf16), preferred_element_type=f32)

    def rotary(t):
        rd = math.floor(D / num_heads / 2)
        nf = rd // 2
        rot = 2 * nf
        if nf == 0:
            return t
        pos = jnp.arange(N, dtype=f32)
        freqs = jnp.linspace(1.0, 10.0 / 2.0, nf) * math.pi
        ang = jnp.repeat(pos[:, None] * freqs[None, :], 2, axis=-1)     # (N, rot)
        cos = jnp.cos(ang).astype(bf16).astype(f32)[None, :, None, :]   # match bf16 tables
        sin = jnp.sin(ang).astype(bf16).astype(f32)[None, :, None, :]
        th = t.reshape(B, N, num_heads, Dh)
        tr, tp = th[..., :rot], th[..., rot:]
        x1, x2 = tr[..., 0::2], tr[..., 1::2]
        rhalf = jnp.stack([-x2, x1], axis=-1).reshape(tr.shape)
        tr = tr * cos + rhalf * sin
        return jnp.concatenate([tr, tp], axis=-1).reshape(B, N, D)

    h = _layernorm(x, p["ln1_g"], p["ln1_b"])
    h = mm(h, p["w1"]) + p["b1"]
    q = rotary(mm(h, p["wq"] * scale) + p["bq"] * scale)
    k = rotary(mm(h, p["wk"]) + p["bk"])
    v = mm(h, p["wv"]) + p["bv"]
    qh = q.reshape(B, N, num_heads, Dh).astype(bf16)
    kh = k.reshape(B, N, num_heads, Dh).astype(bf16)
    vh = v.reshape(B, N, num_heads, Dh).astype(bf16)
    s = jnp.einsum("bqhd,bkhd->bhqk", qh, kh, preferred_element_type=f32)
    s = s - jnp.max(s, axis=-1, keepdims=True)
    e = jnp.exp(s)
    a = e / jnp.sum(e, axis=-1, keepdims=True)
    o = jnp.einsum("bhqk,bkhd->bqhd", a.astype(bf16), vh,
                   preferred_element_type=f32).reshape(B, N, D)
    o = mm(o, p["wo"]) + p["bo"]
    h2 = _layernorm(o, p["ln2_g"], p["ln2_b"])
    h2 = mm(h2, p["w2"]) + p["b2"]
    inter = h2 + x
    g = _layernorm(inter, p["ln3_g"], p["ln3_b"])
    g = mm(g, p["w3"]) + p["b3"]
    g = 0.5 * g * (1.0 + _erf(g * 0.7071067811865476))
    g = _layernorm(g, p["ln4_g"], p["ln4_b"])
    g = mm(g, p["w4"]) + p["b4"]
    return g + inter


if __name__ == "__main__":
    # Small but lane-dense demo: N = D = 128 so every matmul sees 128 rows, the
    # softmax reductions are full-lane, and B = 2 parallel grid steps use both cores.
    B, N, D, H = 2, 128, 128, 4
    key = jax.random.PRNGKey(0)
    kx, kp = jax.random.split(key)
    x = jax.random.normal(kx, (B, N, D), jnp.float32)
    params = init_params(kp, D)
    rotary = make_rotary_tables(N, D, H)

    roll_np = _pltpu_roll_matches_numpy()
    out = vision_encoder_forward(x, params, rotary, H, roll_matches_numpy=roll_np)
    out = jax.block_until_ready(out)

    assert out.shape == (B, N, D) and out.dtype == jnp.float32
    assert bool(jnp.all(jnp.isfinite(out)))

    # Matched mixed-precision reference (bf16 matmul operands in both).  Remaining
    # deviations come only from accumulation-order differences between the fused
    # kernel and XLA across ~10 chained bf16 matmuls + 4 layernorms (typically ~1e-2),
    # so 5e-2 gives robust margin while still catching semantic errors.
    ref = jax.block_until_ready(reference_forward(x, params, H))
    np.testing.assert_allclose(np.asarray(out), np.asarray(ref), rtol=5e-2, atol=5e-2)
    print("KERNEL_OK")
</pallas_src>

<mosaic_0001>
module attributes {stable_mosaic.version = 11 : i64} {
  func.func @probe(%arg0: memref<8x128xf32, #tpu.memory_space<vmem>>, %arg1: memref<8x128xf32, #tpu.memory_space<vmem>>) attributes {dimension_semantics = [], scalar_prefetch = 0 : i64, scratch_operands = 0 : i64, tpu.core_type = #tpu.core_type<tc>} {
    %c0 = arith.constant 0 : index
    %c0_0 = arith.constant 0 : index
    %0 = vector.load %arg0[%c0, %c0_0] : memref<8x128xf32, #tpu.memory_space<vmem>>, vector<8x128xf32>
    %c1_i32 = arith.constant 1 : i32
    %1 = tpu.dynamic_rotate %0 by %c1_i32 dim 1 : vector<8x128xf32>, i32 -> vector<8x128xf32>
    %c0_1 = arith.constant 0 : index
    %c0_2 = arith.constant 0 : index
    %2 = vector.load %arg1[%c0_1, %c0_2] : memref<8x128xf32, #tpu.memory_space<vmem>>, vector<8x128xf32>
    tpu.vector_store %arg1[%c0_1, %c0_2], %1 {strides = array<i32>} : memref<8x128xf32, #tpu.memory_space<vmem>>, vector<8x128xf32>,
    return
  }
}

</mosaic_0001>

<bundles_post_ra>
// kernel: tpu_custom_call.1
= control target key start
LH: loop header
LB: loop body
LE: loop exit
PB: predicated region body
PF: predicated region fallthrough
CT: control target
= control target key end

     0   :  { %6 = vsyncpa [#allocation3], 0  ;;  %s128_s0 = inlined_call_operand.hbm [shape: f32[8,128], index: 0, kind: input, shape index: {}]   ;;  %s129_s1 = inlined_call_operand.hbm [shape: f32[8,128], index: 1, kind: output, shape index: {}]  }
   0x1   :  { %7 = vsyncpa [#allocation4], 0  ;;  %s91_s6 = smov [#allocation2]   ;;  %s43_s10 = scalar_lea.hbm %s128_s0, 128 }
   0x2   :  { %s14_s7 = sshll.u32 %s91_s6, 4  ;;  %p44_p0 = scmp.ne.s32.totalorder %s128_s0, %s43_s10  ;;  %s15_s7 = int_to_ptr.vmem [resolvable:$true] %s14_s7 }
   0x3   :  { %p47_p1 = scmp.lt.u32.totalorder %s43_s10, %s128_s0 }
   0x5   :  { %p49_p2 = pnand %p47_p1, %p44_p0 }
   0x7   :  { %52 = shalt.err (!%p49_p2)
}
   0x8   :  { %s53_s15 = scalar_lea.vmem %s15_s7, 128  ;;  %p58_p4 = scmp.lt.s32.totalorder %s15_s7, %s15_s7 }
   0x9   :  { %p54_p3 = scmp.ne.s32.totalorder %s15_s7, %s53_s15  ;;  %p59_p5 = scmp.lt.s32.totalorder %s53_s15, %s53_s15 }
   0xb   :  { %p60_p6 = por %p59_p5, %p58_p4 }
   0xd   :  { %p61_p7 = pnand %p60_p6, %p54_p3 }
   0xf   :  { %64 = shalt.err (!%p61_p7)
}
  0x10   :  { %17 = dma.hbm_to_vmem [thread:$0]  %s128_s0, 128, %s15_s7, [#allocation3]  }
  0x11   :  { %87 = dma.done.wait [#allocation3], 128  }
  0x12   :  { %88 = vsyncadd [#allocation3], 4294967168  ;;  %v21_v0 = vld [vmem:[#allocation2] sm:$0xff]  ;;  %s92_s18 = smov 1   ;;  %s93_s19 = smov [#allocation5]  }
  0x13   :  { %22 = vrot.lane.b32.xlu0 %v21_v0, %s92_s18  ;;  %s31_s20 = sshll.u32 %s93_s19, 4  ;;  %s32_s20 = int_to_ptr.vmem [resolvable:$true] %s31_s20 }
  0x14   :  { %s65_s21 = scalar_lea.vmem %s32_s20, 128  ;;  %p70_p9 = scmp.lt.s32.totalorder %s32_s20, %s32_s20 }
  0x15   :  { %p66_p8 = scmp.ne.s32.totalorder %s32_s20, %s65_s21  ;;  %p71_p10 = scmp.lt.s32.totalorder %s65_s21, %s65_s21 }
  0x17   :  { %p72_p11 = por %p71_p10, %p70_p9 }
  0x19   :  { %p73_p12 = pnand %p72_p11, %p66_p8 }
  0x85   :  { %v23_v1 = vpop.permute.xlu0 %22 }
  0x86   :  { %24 = vst [vmem:[#allocation5] sm:$0xff] %v23_v1 }
  0x87   :  { %76 = shalt.err (!%p73_p12)
}
  0x88   :  { %s77_s0 = scalar_lea.hbm %s129_s1, 128 }
  0x89   :  { %p78_p13 = scmp.ne.s32.totalorder %s129_s1, %s77_s0  ;;  %p81_p0 = scmp.lt.u32.totalorder %s77_s0, %s129_s1 }
  0x8b   :  { %p83_p1 = pnand %p81_p0, %p78_p13 }
  0x8d   :  { %86 = shalt.err (!%p83_p1)
}
  0x8e   :  { %34 = dma.vmem_to_hbm [thread:$0]  %s32_s20, 128, %s129_s1, [#allocation4]  }
  0x8f   :  { %89 = dma.done.wait [#allocation4], 128  }
  0x90   :  { %90 = vsyncadd [#allocation4], 4294967168 }
  0x91   :  { %38 = vsyncpa [#allocation3], 1 }
  0x92   :  { %39 = vsyncpa [#allocation4], 1 }

</bundles_post_ra>
